<compile_context>
chip_gen: v6e
topology: v6e:2x2x1
jax: 0.10.0
libtpu: 0.0.40
codegen_flags: <defaults>
</compile_context>

<pallas_src>
import jax
import jax.numpy as jnp
from jax import lax
from jax.experimental import pallas as pl
from jax.experimental.pallas import tpu as pltpu


def _round_up(x, m):
    return ((x + m - 1) // m) * m


def _weight_norm(v, g, eps=1e-12):
    # PyTorch weight_norm(dim=0) on a Linear weight (out, in):
    # per-output-row L2 norm over the input dim.  eps avoids NaN on zero rows.
    norm = jnp.sqrt(jnp.sum(v * v, axis=1, keepdims=True) + eps)
    return g * v / norm


def att_module_kernel(bu_ref, h1a_ref, wft_ref, wa_ref, mask_ref, out_ref):
    tB, N, F = bu_ref.shape
    A = wft_ref.shape[1]
    cdt = bu_ref.dtype                     # streaming/compute dtype (f32 or bf16)

    # Collapse batch*regions -> one big MXU matmul (minor dim preserved: free).
    bu2 = bu_ref[...].reshape(tB * N, F)                           # (tB*N, F)

    # img_att = BU_feats @ W_feat^T        (b_feat folded into h1a on host)
    img = jnp.dot(bu2, wft_ref[...], preferred_element_type=jnp.float32)
    img = img.reshape(tB, N, A)                                    # (tB, N, A) f32

    # att1 = dropout(relu(h1_att.unsqueeze(1) + img_att)); dropout = identity (eval)
    att1 = jnp.maximum(h1a_ref[...][:, None, :] + img, 0.0)        # (tB, N, A)

    # att2 = att1 @ W_att^T (single output unit) -> mul + lane reduce.
    # `ba` dropped: a uniform additive constant cancels in softmax.
    scores = jnp.sum(att1 * wa_ref[...], axis=2) + mask_ref[...]   # (tB, N)

    # softmax over the region axis (padded slots carry -1e30 -> exp == 0)
    m = jnp.max(scores, axis=1, keepdims=True)
    e = jnp.exp(scores - m)
    s = jnp.sum(e, axis=1, keepdims=True)
    sm = e * pl.reciprocal(s, approx=True)                         # EUP slot, ~free

    # aw_images = sum_n softmax * BU_feats as ONE block-diagonal MXU matmul:
    #   sm_bd has sm[b, :] in columns [b*N, (b+1)*N), zeros elsewhere,
    #   out = sm_bd @ bu2   -> (tB, F)
    K = tB * N
    sm_tiled = jnp.concatenate([sm] * tB, axis=1)                  # (tB, K): sm[b, c mod N]
    rb = lax.broadcasted_iota(jnp.int32, (tB, K), 0)
    cc = lax.broadcasted_iota(jnp.int32, (tB, K), 1)
    d = cc - rb * N                                                # in-block offset
    sm_bd = jnp.where((d >= 0) & (d < N), sm_tiled, 0.0).astype(cdt)
    out = jnp.dot(sm_bd, bu2, preferred_element_type=jnp.float32)  # (tB, F) f32
    out_ref[...] = out.astype(out_ref.dtype)


def prepare_params(params, *, weights_dtype=jnp.float32, eps=1e-12):
    """weight_norm + transpose to (in, out) + lane padding. Do ONCE per model."""
    A, F = params["wf_v"].shape
    D = params["wd_v"].shape[1]
    A_pad, F_pad, D_pad = _round_up(A, 128), _round_up(F, 128), _round_up(D, 128)

    wf = _weight_norm(params["wf_v"], params["wf_g"], eps)   # (A, F)
    wd = _weight_norm(params["wd_v"], params["wd_g"], eps)   # (A, D)
    wa = _weight_norm(params["wa_v"], params["wa_g"], eps)   # (1, A)

    wft = jnp.zeros((F_pad, A_pad), weights_dtype).at[:F, :A].set(
        wf.T.astype(weights_dtype))
    wdt = jnp.zeros((D_pad, A_pad), weights_dtype).at[:D, :A].set(
        wd.T.astype(weights_dtype))
    # Both biases are broadcast along the region axis -> fold them together and
    # add them to the (hoisted) decoder projection.  `ba` intentionally dropped.
    bdf = jnp.zeros((1, A_pad), jnp.float32).at[0, :A].set(params["bf"] + params["bd"])
    wa_p = jnp.zeros((1, A_pad), jnp.float32).at[0, :A].set(wa[0])
    return dict(wft=wft, wdt=wdt, bdf=bdf, wa=wa_p,
                dims=dict(F=F, D=D, A=A, F_pad=F_pad, D_pad=D_pad, A_pad=A_pad))


def prepare_bu(bu_feats, prep, *, block_b=16):
    """Pad + cast BU_feats ONCE per image (it is constant across decode steps)."""
    B, N, F = bu_feats.shape
    d = prep["dims"]
    assert F == d["F"]
    stream_dtype = prep["wft"].dtype
    N_pad = _round_up(N, 8)
    tB = min(block_b, _round_up(B, 8))          # multiple of 8, don't over-pad tiny B
    B_pad = _round_up(B, tB)

    bu_p = jnp.zeros((B_pad, N_pad, d["F_pad"]), stream_dtype)
    bu_p = bu_p.at[:B, :N, :F].set(bu_feats.astype(stream_dtype))
    # Additive softmax mask (f32!): 0 for real regions, -1e30 for padded N slots.
    mask = jnp.where(jnp.arange(N_pad) < N, 0.0, -1e30).astype(jnp.float32)
    return dict(bu=bu_p, mask=mask.reshape(1, N_pad), B=B, N=N, tB=tB)


def att_module(bu_prep, h1, prep, *, vmem_limit_bytes=48 * 1024 * 1024):
    d = prep["dims"]
    bu_p = bu_prep["bu"]
    B, tB = bu_prep["B"], bu_prep["tB"]
    B_pad, N_pad, F_pad = bu_p.shape
    D_pad, A_pad = d["D_pad"], d["A_pad"]
    assert h1.shape == (B, d["D"])
    assert bu_p.dtype == prep["wft"].dtype

    # Hoisted decoder projection (tiny): h1_att = h1 @ Wd^T + b_dec + b_feat.
    h1_p = jnp.zeros((B_pad, D_pad), prep["wdt"].dtype).at[:B, :d["D"]].set(
        h1.astype(prep["wdt"].dtype))
    h1a = jnp.dot(h1_p, prep["wdt"], preferred_element_type=jnp.float32) + prep["bdf"]

    grid = (B_pad // tB,)
    itemsize = jnp.dtype(bu_p.dtype).itemsize

    flops = int(2 * B_pad * N_pad * F_pad * A_pad      # feature projection
                + 2 * B_pad * N_pad * A_pad            # attention scores
                + 2 * B_pad * tB * N_pad * F_pad)      # block-diag weighted sum
    bytes_accessed = int(bu_p.size * itemsize + h1a.size * 4
                         + prep["wft"].size * itemsize
                         + (2 * A_pad + N_pad) * 4
                         + B_pad * F_pad * 4)

    out = pl.pallas_call(
        att_module_kernel,
        out_shape=jax.ShapeDtypeStruct((B_pad, F_pad), jnp.float32),
        grid=grid,
        in_specs=[
            pl.BlockSpec((tB, N_pad, F_pad), lambda i: (i, 0, 0)),   # bu tile (streamed)
            pl.BlockSpec((tB, A_pad), lambda i: (i, 0)),             # hoisted h1_att
            pl.BlockSpec((F_pad, A_pad), lambda i: (0, 0)),          # W_feat^T (resident)
            pl.BlockSpec((1, A_pad), lambda i: (0, 0)),              # w_att
            pl.BlockSpec((1, N_pad), lambda i: (0, 0)),              # softmax pad mask
        ],
        out_specs=pl.BlockSpec((tB, F_pad), lambda i: (i, 0)),       # lane-dense slab
        compiler_params=pltpu.CompilerParams(
            dimension_semantics=("parallel",),
            vmem_limit_bytes=vmem_limit_bytes),
        cost_estimate=pl.CostEstimate(flops=flops,
                                      transcendentals=B_pad * N_pad + B_pad,
                                      bytes_accessed=bytes_accessed),
    )(bu_p, h1a, prep["wft"], prep["wa"], bu_prep["mask"])

    return out[:B, :d["F"]]


def att_module_ref(bu_feats, h1, params):
    """Pure-JAX reference mirroring the PyTorch forward (eval mode)."""
    wf = _weight_norm(params["wf_v"], params["wf_g"])
    wd = _weight_norm(params["wd_v"], params["wd_g"])
    wa = _weight_norm(params["wa_v"], params["wa_g"])
    h1_att = h1 @ wd.T + params["bd"]                               # (B, A)
    img_att = jnp.einsum("bnf,af->bna", bu_feats, wf) + params["bf"]
    att1 = jnp.maximum(h1_att[:, None, :] + img_att, 0.0)
    att2 = jnp.einsum("bna,ka->bnk", att1, wa) + params["ba"]       # (B, N, 1)
    sm = jax.nn.softmax(att2[..., 0], axis=1)
    return jnp.sum(bu_feats * sm[:, :, None], axis=1)


if __name__ == "__main__":
    B, N = 2, 8
    featureSize, decodeSize, attSize = 64, 32, 32

    key = jax.random.PRNGKey(0)
    ks = jax.random.split(key, 10)
    bu_feats = jax.random.normal(ks[0], (B, N, featureSize), jnp.float32)
    h1 = jax.random.normal(ks[1], (B, decodeSize), jnp.float32)

    params = dict(
        wf_v=0.1 * jax.random.normal(ks[2], (attSize, featureSize), jnp.float32),
        wf_g=1.0 + 0.05 * jax.random.normal(ks[3], (attSize, 1), jnp.float32),
        bf=0.1 * jax.random.normal(ks[4], (attSize,), jnp.float32),
        wd_v=0.1 * jax.random.normal(ks[5], (attSize, decodeSize), jnp.float32),
        wd_g=1.0 + 0.05 * jax.random.normal(ks[6], (attSize, 1), jnp.float32),
        bd=0.1 * jax.random.normal(ks[7], (attSize,), jnp.float32),
        wa_v=0.1 * jax.random.normal(ks[8], (1, attSize), jnp.float32),
        wa_g=jnp.ones((1, 1), jnp.float32),
        ba=0.1 * jax.random.normal(ks[9], (1,), jnp.float32),
    )

    ref = att_module_ref(bu_feats, h1, params)

    # f32 path (exact).
    prep_f32 = prepare_params(params, weights_dtype=jnp.float32)
    bu_f32 = prepare_bu(bu_feats, prep_f32, block_b=16)      # once per image
    out = jax.block_until_ready(att_module(bu_f32, h1, prep_f32))
    assert out.shape == (B, featureSize)
    assert jnp.allclose(out, ref, atol=2e-3, rtol=2e-3), "f32 kernel mismatch vs ref"

    # bf16 streaming path (recommended on v6e/v7x: 2x MXU throughput, half bu DMA).
    prep_bf16 = prepare_params(params, weights_dtype=jnp.bfloat16)
    bu_bf16 = prepare_bu(bu_feats, prep_bf16, block_b=16)
    out_bf16 = jax.block_until_ready(att_module(bu_bf16, h1, prep_bf16))
    assert jnp.allclose(out_bf16, ref, atol=5e-2, rtol=5e-2), "bf16 kernel mismatch vs ref"

    print("KERNEL_OK")
</pallas_src>

<mosaic_0001>
module attributes {stable_mosaic.version = 11 : i64} {
  func.func @att_module_kernel(%arg0: i32, %arg1: memref<8x8x128xf32, #tpu.memory_space<vmem>>, %arg2: memref<8x128xf32, #tpu.memory_space<vmem>>, %arg3: memref<128x128xf32, #tpu.memory_space<vmem>>, %arg4: memref<1x128xf32, #tpu.memory_space<vmem>>, %arg5: memref<1x8xf32, #tpu.memory_space<vmem>>, %arg6: memref<8x128xf32, #tpu.memory_space<vmem>>) attributes {dimension_semantics = [#tpu.dimension_semantics<parallel>], iteration_bounds = array<i64: 1>, scalar_prefetch = 0 : i64, scratch_operands = 0 : i64, tpu.core_type = #tpu.core_type<tc>, window_params = [{transform_indices = @transform_0, window_bounds = array<i64: 8, 8, 128>}, {transform_indices = @transform_1, window_bounds = array<i64: 8, 128>}, {pipeline_mode = #tpu.pipeline_mode<synchronous>, transform_indices = @transform_2, window_bounds = array<i64: 128, 128>}, {pipeline_mode = #tpu.pipeline_mode<synchronous>, transform_indices = @transform_3, window_bounds = array<i64: 1, 128>}, {pipeline_mode = #tpu.pipeline_mode<synchronous>, transform_indices = @transform_4, window_bounds = array<i64: 1, 8>}, {transform_indices = @transform_5, window_bounds = array<i64: 8, 128>}]} {
    %c0 = arith.constant 0 : index
    %c0_0 = arith.constant 0 : index
    %c0_1 = arith.constant 0 : index
    %0 = vector.load %arg1[%c0, %c0_0, %c0_1] : memref<8x8x128xf32, #tpu.memory_space<vmem>>, vector<8x8x128xf32>
    %1 = vector.shape_cast %0 : vector<8x8x128xf32> to vector<64x128xf32>
    %c0_2 = arith.constant 0 : index
    %c0_3 = arith.constant 0 : index
    %2 = vector.load %arg3[%c0_2, %c0_3] : memref<128x128xf32, #tpu.memory_space<vmem>>, vector<128x128xf32>
    %cst = arith.constant dense<0.000000e+00> : vector<64x128xf32>
    %3 = tpu.matmul %1, %2, %cst {dimension_numbers = #tpu.dot_dimension_numbers<[1], [0], [0], [1], [0, 0, 1, 1], [], []>} : vector<64x128xf32>, vector<128x128xf32>, vector<64x128xf32> -> vector<64x128xf32>
    %4 = vector.shape_cast %3 : vector<64x128xf32> to vector<8x8x128xf32>
    %c0_4 = arith.constant 0 : index
    %c0_5 = arith.constant 0 : index
    %5 = vector.load %arg2[%c0_4, %c0_5] : memref<8x128xf32, #tpu.memory_space<vmem>>, vector<8x128xf32>
    %6 = vector.shape_cast %5 : vector<8x128xf32> to vector<8x1x128xf32>
    %7 = vector.broadcast %6 : vector<8x1x128xf32> to vector<8x8x128xf32>
    %8 = arith.addf %7, %4 : vector<8x8x128xf32>
    %cst_6 = arith.constant 0.000000e+00 : f32
    %9 = vector.broadcast %cst_6 : f32 to vector<8x8x128xf32>
    %10 = arith.maximumf %8, %9 : vector<8x8x128xf32>
    %c0_7 = arith.constant 0 : index
    %c0_8 = arith.constant 0 : index
    %11 = vector.load %arg4[%c0_7, %c0_8] : memref<1x128xf32, #tpu.memory_space<vmem>>, vector<1x128xf32>
    %12 = vector.shape_cast %11 : vector<1x128xf32> to vector<1x1x128xf32>
    %13 = vector.broadcast %12 : vector<1x1x128xf32> to vector<8x8x128xf32>
    %14 = arith.mulf %10, %13 : vector<8x8x128xf32>
    %cst_9 = arith.constant dense<0.000000e+00> : vector<8x8xf32>
    %15 = vector.multi_reduction <add>, %14, %cst_9 [2] : vector<8x8x128xf32> to vector<8x8xf32>
    %c0_10 = arith.constant 0 : index
    %c0_11 = arith.constant 0 : index
    %16 = vector.load %arg5[%c0_10, %c0_11] : memref<1x8xf32, #tpu.memory_space<vmem>>, vector<1x8xf32>
    %17 = vector.broadcast %16 : vector<1x8xf32> to vector<8x8xf32>
    %18 = arith.addf %15, %17 : vector<8x8xf32>
    %cst_12 = arith.constant dense<0xFF800000> : vector<8xf32>
    %19 = vector.multi_reduction <maximumf>, %18, %cst_12 [1] : vector<8x8xf32> to vector<8xf32>
    %20 = vector.shape_cast %19 : vector<8xf32> to vector<8x1xf32>
    %21 = vector.broadcast %20 : vector<8x1xf32> to vector<8x8xf32>
    %22 = arith.subf %18, %21 : vector<8x8xf32>
    %23 = math.exp %22 : vector<8x8xf32>
    %cst_13 = arith.constant dense<0.000000e+00> : vector<8xf32>
    %24 = vector.multi_reduction <add>, %23, %cst_13 [1] : vector<8x8xf32> to vector<8xf32>
    %25 = vector.shape_cast %24 : vector<8xf32> to vector<8x1xf32>
    %26 = tpu.reciprocal %25 {approx = true} : vector<8x1xf32> -> vector<8x1xf32>
    %27 = vector.broadcast %26 : vector<8x1xf32> to vector<8x8xf32>
    %28 = arith.mulf %23, %27 : vector<8x8xf32>
    %29 = tpu.concatenate %28, %28, %28, %28, %28, %28, %28, %28 in 1 : vector<8x8xf32>, vector<8x8xf32>, vector<8x8xf32>, vector<8x8xf32>, vector<8x8xf32>, vector<8x8xf32>, vector<8x8xf32>, vector<8x8xf32> -> vector<8x64xf32>
    %30 = tpu.iota {dimensions = array<i32: 0>} : vector<8x64xi32>
    %31 = tpu.iota {dimensions = array<i32: 1>} : vector<8x64xi32>
    %c8_i32 = arith.constant 8 : i32
    %32 = vector.broadcast %c8_i32 : i32 to vector<8x64xi32>
    %33 = arith.muli %30, %32 : vector<8x64xi32>
    %34 = arith.subi %31, %33 : vector<8x64xi32>
    %c0_i32 = arith.constant 0 : i32
    %35 = vector.broadcast %c0_i32 : i32 to vector<8x64xi32>
    %36 = arith.cmpi sge, %34, %35 : vector<8x64xi32>
    %c8_i32_14 = arith.constant 8 : i32
    %37 = vector.broadcast %c8_i32_14 : i32 to vector<8x64xi32>
    %38 = arith.cmpi slt, %34, %37 : vector<8x64xi32>
    %39 = arith.andi %36, %38 : vector<8x64xi1>
    %cst_15 = arith.constant 0.000000e+00 : f32
    %40 = vector.broadcast %cst_15 : f32 to vector<8x64xf32>
    %41 = arith.select %39, %29, %40 : vector<8x64xi1>, vector<8x64xf32>
    %cst_16 = arith.constant dense<0.000000e+00> : vector<8x128xf32>
    %42 = tpu.matmul %41, %1, %cst_16 {dimension_numbers = #tpu.dot_dimension_numbers<[1], [0], [0], [1], [0, 0, 1, 1], [], []>} : vector<8x64xf32>, vector<64x128xf32>, vector<8x128xf32> -> vector<8x128xf32>
    %c0_17 = arith.constant 0 : index
    %c0_18 = arith.constant 0 : index
    %43 = vector.load %arg6[%c0_17, %c0_18] : memref<8x128xf32, #tpu.memory_space<vmem>>, vector<8x128xf32>
    tpu.vector_store %arg6[%c0_17, %c0_18], %42 {strides = array<i32>} : memref<8x128xf32, #tpu.memory_space<vmem>>, vector<8x128xf32>,
    return
  }
  func.func @transform_0(%arg0: i32) -> (i32, i32, i32) {
    %c0_i32 = arith.constant 0 : i32
    %c0_i32_0 = arith.constant 0 : i32
    %c0_i32_1 = arith.constant 0 : i32
    return %arg0, %c0_i32, %c0_i32_0 : i32, i32, i32
  }
  func.func @transform_1(%arg0: i32) -> (i32, i32) {
    %c0_i32 = arith.constant 0 : i32
    %c0_i32_0 = arith.constant 0 : i32
    return %arg0, %c0_i32 : i32, i32
  }
  func.func @transform_2(%arg0: i32) -> (i32, i32) {
    %c0_i32 = arith.constant 0 : i32
    %c0_i32_0 = arith.constant 0 : i32
    %c0_i32_1 = arith.constant 0 : i32
    return %c0_i32, %c0_i32_0 : i32, i32
  }
  func.func @transform_3(%arg0: i32) -> (i32, i32) {
    %c0_i32 = arith.constant 0 : i32
    %c0_i32_0 = arith.constant 0 : i32
    %c0_i32_1 = arith.constant 0 : i32
    return %c0_i32, %c0_i32_0 : i32, i32
  }
  func.func @transform_4(%arg0: i32) -> (i32, i32) {
    %c0_i32 = arith.constant 0 : i32
    %c0_i32_0 = arith.constant 0 : i32
    %c0_i32_1 = arith.constant 0 : i32
    return %c0_i32, %c0_i32_0 : i32, i32
  }
  func.func @transform_5(%arg0: i32) -> (i32, i32) {
    %c0_i32 = arith.constant 0 : i32
    %c0_i32_0 = arith.constant 0 : i32
    return %arg0, %c0_i32 : i32, i32
  }
}

</mosaic_0001>

<bundles_post_ra>
// kernel: tpu_custom_call.1
= control target key start
LH: loop header
LB: loop body
LE: loop exit
PB: predicated region body
PF: predicated region fallthrough
CT: control target
= control target key end

     0   :  { %10 = vsyncpa [#allocation3], 0  ;;  %s1745_s0 = inlined_call_operand.hbm [shape: f32[8,8,128], index: 0, kind: input, shape index: {}]   ;;  %s1746_s1 = inlined_call_operand.hbm [shape: f32[8,128], index: 1, kind: input, shape index: {}]   ;;  %s1747_s2 = inlined_call_operand.hbm [shape: f32[128,128], index: 2, kind: input, shape index: {}]   ;;  %s1748_s3 = inlined_call_operand.vmem [shape: f32[1,128], index: 3, kind: input, shape index: {}]   ;;  %s1749_s4 = inlined_call_operand.vmem [shape: f32[1,8], index: 4, kind: input, shape index: {}]   ;;  %s1750_s5 = inlined_call_operand.hbm [shape: f32[8,128], index: 5, kind: output, shape index: {}]  }
   0x1   :  { %11 = vsyncpa [#allocation6], 0 }
   0x2   :  { %12 = vsyncpa [#allocation4], 0  ;;  %s1307_s18 = smov [#allocation5]   ;;  %s1308_s20 = smov [#allocation2]  }
   0x3   :  { %s31_s19 = sshll.u32 %s1307_s18, 4  ;;  %s18_s21 = sshll.u32 %s1308_s20, 4  ;;  %s32_s19 = int_to_ptr.vmem [resolvable:$true] %s31_s19  ;;  %s19_s21 = int_to_ptr.vmem [resolvable:$true] %s18_s21 }
   0x4   :  { %s1229_s22 = scalar_lea.vmem %s32_s19, 128  ;;  %p1234_p1 = scmp.lt.s32.totalorder %s32_s19, %s32_s19 }
   0x5   :  { %p1230_p0 = scmp.ne.s32.totalorder %s32_s19, %s1229_s22  ;;  %p1235_p2 = scmp.lt.s32.totalorder %s1229_s22, %s1229_s22 }
   0x7   :  { %p1236_p3 = por %p1235_p2, %p1234_p1 }
   0x9   :  { %p1237_p4 = pnand %p1236_p3, %p1230_p0 }
   0xb   :  { %1240 = shalt.err (!%p1237_p4)
}
   0xc   :  { %34 = dma.hbm_to_vmem [thread:$0]  %s1746_s1, 128, %s32_s19, [#allocation6]  }
   0xd   :  { %s1249_s25 = scalar_lea.vmem %s19_s21, 1024  ;;  %p1254_p6 = scmp.lt.s32.totalorder %s19_s21, %s19_s21 }
   0xe   :  { %p1250_p5 = scmp.ne.s32.totalorder %s19_s21, %s1249_s25  ;;  %p1255_p7 = scmp.lt.s32.totalorder %s1249_s25, %s1249_s25 }
  0x10   :  { %p1256_p8 = por %p1255_p7, %p1254_p6 }
  0x12   :  { %p1257_p9 = pnand %p1256_p8, %p1250_p5 }
  0x14   :  { %1260 = shalt.err (!%p1257_p9)
}
  0x15   :  { %s1309_s26 = smov 128   ;;  %s1310_s27 = smov 8  }
  0x16   :  { %24 = dma.hbm_to_vmem [thread:$0]  %s1745_s0, 1024, %s19_s21, [#allocation3], %s1309_s26, %s1309_s26, %s1310_s27  }
  0x17   :  { %s1311_s30 = smov [#allocation7]  }
  0x18   :  { %s40_s6 = sshll.u32 %s1311_s30, 4  ;;  %s41_s6 = int_to_ptr.vmem [resolvable:$true] %s40_s6 }
  0x19   :  { %s1269_s7 = scalar_lea.vmem %s41_s6, 2048  ;;  %p1274_p11 = scmp.lt.s32.totalorder %s41_s6, %s41_s6 }
  0x1a   :  { %p1270_p10 = scmp.ne.s32.totalorder %s41_s6, %s1269_s7  ;;  %p1275_p12 = scmp.lt.s32.totalorder %s1269_s7, %s1269_s7 }
  0x1c   :  { %p1276_p13 = por %p1275_p12, %p1274_p11 }
  0x1e   :  { %p1277_p0 = pnand %p1276_p13, %p1270_p10 }
  0x20   :  { %1280 = shalt.err (!%p1277_p0)
}
  0x21   :  { %46 = dma.hbm_to_vmem [thread:$0]  %s1747_s2, 2048, %s41_s6, [#allocation6], %s1309_s26, %s1309_s26, %s1310_s27  }
  0x22   :  { %1301 = dma.done.wait [#allocation3], 1024  }
  0x23   :  { %1302 = vsyncadd [#allocation3], 4294966272 }
  0x24   :  { %1303 = dma.done.wait [#allocation6], 2176  }
  0x25   :  { %1304 = vsyncadd [#allocation6], 4294965120  ;;  %v83_v0 = vld [vmem:[#allocation7 + $0x78] sm:$0xff]  ;;  %v82_v1 = vld [vmem:[#allocation7 + $0x70] sm:$0xff]  ;;  %v1312_v24 = vmov 1966171168   ;;  %v195_v26 = vlaneseq }
  0x26   :  { %1127 = vmatprep.subr.mxu0 %v83_v0  ;;  %v81_v2 = vld [vmem:[#allocation7 + $0x68] sm:$0xff]  ;;  %v80_v3 = vld [vmem:[#allocation7 + $0x60] sm:$0xff]  ;;  %v1356_v4 = vld [vmem:[#allocation2] sm:$0xff]  ;;  %v193_v25 = vunpack.c.l.s4 %v1312_v24  ;;  %vm411_vm0 = vcmask 1041409   ;;  %vm413_vm1 = vcmask 1042434   ;;  %vm415_vm2 = vcmask 1043459  }
  0x27   :  { %1128 = vmatpush3.msra.mxu0 %v83_v0  ;;  %v79_v5 = vld [vmem:[#allocation7 + $0x58] sm:$0xff]  ;;  %1159 = vmatprep.mubr.f32.mxu0 %v1356_v4  ;;  %v78_v6 = vld [vmem:[#allocation7 + $0x50] sm:$0xff]  ;;  %v77_v7 = vld [vmem:[#allocation7 + $0x48] sm:$0xff]  ;;  %v1381_v28 = vshrl.u32 %v195_v26, 7  ;;  %vm417_vm3 = vcmask 1044484   ;;  %vm419_vm4 = vcmask 1045509  }
  0x28   :  { %1129 = vmatprep.subr.mxu0 %v82_v1  ;;  %v76_v8 = vld [vmem:[#allocation7 + $0x40] sm:$0xff]  ;;  %v75_v9 = vld [vmem:[#allocation7 + $0x38] sm:$0xff]  ;;  %v74_v10 = vld [vmem:[#allocation7 + $0x30] sm:$0xff]  ;;  %v194_v27 = vunpack.c.0.s8 %v193_v25  ;;  %vm421_vm5 = vcmask 1046534   ;;  %vm423_vm6 = vcmask 1047559   ;;  %vm426_vm7 = vcmask 64512  }
  0x29   :  { %1130 = vmatpush3.msra.mxu0 %v82_v1  ;;  %v73_v11 = vld [vmem:[#allocation7 + $0x28] sm:$0xff]  ;;  %v72_v12 = vld [vmem:[#allocation7 + $0x20] sm:$0xff]  ;;  %v71_v13 = vld [vmem:[#allocation7 + $0x18] sm:$0xff]  ;;  %v1385_v35 = vsub.s32 0, %v1381_v28  ;;  %vm1315_vm8 = vmmov 0   ;;  %vm980_vm9 = vcmask 130048  }
  0x2a   :  { %1131 = vmatprep.subr.mxu0 %v81_v2  ;;  %v70_v14 = vld [vmem:[#allocation7 + $0x10] sm:$0xff]  ;;  %v69_v15 = vld [vmem:[#allocation7 + $0x8] sm:$0xff]  ;;  %v68_v16 = vld [vmem:[#allocation7] sm:$0xff]  ;;  %v197_v29 = vsub.s32 %v194_v27, %v1381_v28  ;;  %vm982_vm10 = vcmask 195584   ;;  %vm984_vm11 = vcmask 261120   ;;  %vm986_vm12 = vcmask 326656  }
  0x2b   :  { %1132 = vmatpush3.msra.mxu0 %v81_v2  ;;  %v1359_v17 = vld [vmem:[#allocation2 + $0x8] sm:$0xff]  ;;  %v1361_v18 = vld [vmem:[#allocation2 + $0x10] sm:$0xff]  ;;  %v1365_v19 = vld [vmem:[#allocation2 + $0x18] sm:$0xff]  ;;  %vm988_vm15 = vcmask 392192  }
  0x2c   :  { %1133 = vmatprep.subr.mxu0 %v80_v3  ;;  %v1367_v20 = vld [vmem:[#allocation2 + $0x20] sm:$0xff]  ;;  %v1371_v21 = vld [vmem:[#allocation2 + $0x28] sm:$0xff]  ;;  %v1373_v22 = vld [vmem:[#allocation2 + $0x30] sm:$0xff] }
  0x2d   :  { %1134 = vmatpush3.msra.mxu0 %v80_v3  ;;  %v1377_v23 = vld [vmem:[#allocation2 + $0x38] sm:$0xff]  ;;  %v189_v30 = vld [vmem:[#allocation5] sm:$0xff] }
  0x2e   :  { %1135 = vmatprep.subr.mxu0 %v79_v5  ;;  %v198_v31 = vrot.slane %v189_v30, %v197_v29  ;;  %v191_v33 = vcombine.high %v189_v30, %v189_v30  ;;  %v1091_v48 = vld [vmem:[%s1748_s3] ss:$0 sm:$0xff] }
  0x2f   :  { %1136 = vmatpush3.msra.mxu0 %v79_v5 }
  0x30   :  { %1137 = vmatprep.subr.mxu0 %v78_v6  ;;  %v206_v32 = vcombine.high %v198_v31, %v198_v31  ;;  %v205_v36 = vrot.slane %v191_v33, %v197_v29  ;;  %v214_v37 = vrot.slane %v198_v31, %v197_v29  ;;  %v1092_v33 = vld [vmem:[%s1749_s4] ss:$0 sm:$0xff]  ;;  %s1316_s4 = smov [#allocation8]  }
  0x31   :  { %1138 = vmatpush3.msra.mxu0 %v78_v6  ;;  %s1081_s10 = sshll.u32 %s1316_s4, 4  ;;  %s1082_s10 = int_to_ptr.vmem [resolvable:$true] %s1081_s10 }
  0x32   :  { %1139 = vmatprep.subr.mxu0 %v77_v7  ;;  %v228_v34 = vrot.slane %v206_v32, %v197_v29  ;;  %v207_v40 = vcombine.high %v205_v36, %v205_v36  ;;  %v243_v41 = vrot.slane %v214_v37, %v1385_v35  ;;  %v236_v42 = vcombine.high %v214_v37, %v214_v37  ;;  %s1281_s11 = scalar_lea.vmem %s1082_s10, 128  ;;  %p1286_p2 = scmp.lt.s32.totalorder %s1082_s10, %s1082_s10 }
  0x33   :  { %1140 = vmatpush3.msra.mxu0 %v77_v7  ;;  %v221_v52 = vrot.slane %v205_v36, %v197_v29  ;;  %v1313_v32 = vmov 0   ;;  %p1282_p1 = scmp.ne.s32.totalorder %s1082_s10, %s1281_s11  ;;  %p1287_p3 = scmp.lt.s32.totalorder %s1281_s11, %s1281_s11 }
  0x34   :  { %1141 = vmatprep.subr.mxu0 %v76_v8  ;;  %v247_v38 = vrot.slane %v228_v34, %v1385_v35  ;;  %v238_v39 = vcombine.high %v228_v34, %v228_v34  ;;  %v235_v46 = vrot.slane %v207_v40, %v197_v29  ;;  %v251_v51 = vrot.slane %v236_v42, %v1385_v35 }
  0x35   :  { %1142 = vmatpush3.msra.mxu0 %v76_v8  ;;  %v259_v62 = vrot.slane %v221_v52, %v1385_v35  ;;  %v237_v63 = vcombine.high %v221_v52, %v221_v52  ;;  %1201 = vset.pattern.permute.xlu0 %v1313_v32  ;;  %p1288_p4 = por %p1287_p3, %p1286_p2 }
  0x36   :  { %1143 = vmatprep.subr.mxu0 %v75_v9  ;;  %v255_v45 = vrot.slane %v238_v39, %v1385_v35  ;;  %v239_v54 = vcombine.high %v235_v46, %v235_v46  ;;  %v263_v58 = vrot.slane %v235_v46, %v1385_v35  ;;  %1200 = vset.pattern.permute.xlu1 %v1313_v32 }
  0x37   :  { %1144 = vmatpush3.msra.mxu0 %v75_v9  ;;  %v267_v9 = vrot.slane %v237_v63, %v1385_v35  ;;  %p1289_p5 = pnand %p1288_p4, %p1282_p1 }
  0x38   :  { %1145 = vmatprep.subr.mxu0 %v74_v10  ;;  %v271_v1 = vrot.slane %v239_v54, %v1385_v35 }
  0x39   :  { %1146 = vmatpush3.msra.mxu0 %v74_v10 }
  0x3a   :  { %1147 = vmatprep.subr.mxu0 %v73_v11 }
  0x3b   :  { %1148 = vmatpush3.msra.mxu0 %v73_v11 }
  0x3c   :  { %1149 = vmatprep.subr.mxu0 %v72_v12 }
  0x3d   :  { %1150 = vmatpush3.msra.mxu0 %v72_v12 }
  0x3e   :  { %1151 = vmatprep.subr.mxu0 %v71_v13 }
  0x3f   :  { %1152 = vmatpush3.msra.mxu0 %v71_v13 }
  0x40   :  { %1153 = vmatprep.subr.mxu0 %v70_v14 }
  0x41   :  { %1154 = vmatpush3.msra.mxu0 %v70_v14 }
  0x42   :  { %1155 = vmatprep.subr.mxu0 %v69_v15 }
  0x43   :  { %1156 = vmatpush3.msra.mxu0 %v69_v15 }
  0x44   :  { %1157 = vmatprep.subr.mxu0 %v68_v16 }
  0x45   :  { %1158 = vmatpush3.msra.mxu0 %v68_v16 }
  0x46   :  { %1160 = vmatmul.mubr.f32.vlgmr.msra.gmra.mxu0 %v1359_v17 }
  0x47   :  { %1162 = vmatprep.mubr.f32.mxu0 %v1361_v18 }
  0x4a   :  { %1163 = vmatmul.mubr.f32.gmra.mxu0 %v1365_v19 }
  0x4b   :  { %1165 = vmatprep.mubr.f32.mxu0 %v1367_v20 }
  0x4e   :  { %1166 = vmatmul.mubr.f32.gmra.mxu0 %v1371_v21 }
  0x4f   :  { %1168 = vmatprep.mubr.f32.mxu0 %v1373_v22 }
  0x52   :  { %1169 = vmatmul.mubr.f32.gmra.mxu0 %v1377_v23 }
 0x106   :  { %v1161_v43 = vpop.f32.mrf.mxu0 }
 0x107   :  { %v281_v44 = vadd.f32 %v1161_v43, %v247_v38 }
 0x108   :  { %v150_v47 = vpop.f32.mrf.mxu0 }
 0x109   :  { %v289_v49 = vmax.f32 %v281_v44, 0.0  ;;  %v280_v50 = vadd.f32 %v243_v41, %v150_v47 }
 0x10a   :  { %v1164_v53 = vpop.f32.mrf.mxu0 }
 0x10b   :  { %v288_v55 = vmax.f32 %v280_v50, 0.0  ;;  %v283_v56 = vadd.f32 %v1164_v53, %v255_v45  ;;  %v304_v57 = vmul.f32 %v1091_v48, %v289_v49  ;;  %v1420_v53 = vand.u32 127, %v195_v26 }
 0x10c   :  { %v160_v59 = vpop.f32.mrf.mxu0 }
 0x10d   :  { %v291_v60 = vmax.f32 %v283_v56, 0.0  ;;  %v282_v61 = vadd.f32 %v251_v51, %v160_v59  ;;  %313 = vadd.xlane.f32.xlu0 %v304_v57  ;;  %v303_v5 = vmul.f32 %v1091_v48, %v288_v55  ;;  %v1424_v55 = vsub.s32 %v1420_v53, %v1381_v28 }
 0x10e   :  { %v1167_v0 = vpop.f32.mrf.mxu0 }
 0x10f   :  { %v290_v2 = vmax.f32 %v282_v61, 0.0  ;;  %v285_v3 = vadd.f32 %v1167_v0, %v263_v58  ;;  %v306_v6 = vmul.f32 %v1091_v48, %v291_v60 }
 0x110   :  { %v170_v7 = vpop.f32.mrf.mxu0 }
 0x111   :  { %v284_v8 = vadd.f32 %v259_v62, %v170_v7  ;;  %311 = vadd.xlane.f32.xlu0 %v303_v5  ;;  %317 = vadd.xlane.f32.xlu1 %v306_v6  ;;  %v293_v11 = vmax.f32 %v285_v3, 0.0  ;;  %v305_v14 = vmul.f32 %v1091_v48, %v290_v2 }
 0x112   :  { %v1170_v10 = vpop.f32.mrf.mxu0 }
 0x113   :  { %v292_v12 = vmax.f32 %v284_v8, 0.0  ;;  %v287_v13 = vadd.f32 %v1170_v10, %v271_v1  ;;  %v308_v29 = vmul.f32 %v1091_v48, %v293_v11 }
 0x114   :  { %v180_v15 = vpop.f32.mrf.mxu0 }
 0x115   :  { %v286_v16 = vadd.f32 %v267_v9, %v180_v15  ;;  %315 = vadd.xlane.f32.xlu1 %v305_v14  ;;  %v307_v24 = vmul.f32 %v1091_v48, %v292_v12  ;;  %v295_v25 = vmax.f32 %v287_v13, 0.0  ;;  %v437_v14 = vsub.s32 1, %v1381_v28 }
 0x116   :  { %v461_v15 = vsub.s32 7, %v1381_v28 }
 0x117   :  { %v294_v27 = vmax.f32 %v286_v16, 0.0  ;;  %319 = vadd.xlane.f32.xlu0 %v307_v24  ;;  %v310_v31 = vmul.f32 %v1091_v48, %v295_v25  ;;  %v441_v16 = vsub.s32 2, %v1381_v28 }
 0x119   :  { %321 = vadd.xlane.f32.xlu1 %v308_v29  ;;  %v309_v30 = vmul.f32 %v1091_v48, %v294_v27 }
 0x11b   :  { %323 = vadd.xlane.f32.xlu0 %v309_v30  ;;  %v445_v30 = vsub.s32 3, %v1381_v28 }
 0x11d   :  { %325 = vadd.xlane.f32.xlu1 %v310_v31 }
 0x131   :  { %334 = vbcast.lane.b32.xlu0 %v1092_v33, 256 }
 0x196   :  { %v314_v34 = vpop.xlane.xlu0 %313 }
 0x19a   :  { %v312_v36 = vpop.xlane.xlu0 %311  ;;  %v318_v39 = vpop.xlane.xlu1 %317 }
 0x19e   :  { %v316_v45 = vpop.xlane.xlu1 %315 }
 0x1a0   :  { %v320_v37 = vpop.xlane.xlu0 %319 }
 0x1a2   :  { %v322_v47 = vpop.xlane.xlu1 %321 }
 0x1a4   :  { %v324_v38 = vpop.xlane.xlu0 %323 }
 0x1a6   :  { %v326_v50 = vpop.xlane.xlu1 %325 }
 0x1a8   :  { %v335_v40 = vpop.permute.xlu0 %334 }
 0x1a9   :  { %v1401_v41 = vadd.f32 %v335_v40, %v318_v39  ;;  %v1403_v42 = vadd.f32 %v335_v40, %v314_v34  ;;  %v1407_v43 = vadd.f32 %v335_v40, %v324_v38  ;;  %v337_v44 = vadd.f32 %v335_v40, %v312_v36 }
 0x1aa   :  { %v1410_v46 = vadd.f32 %v335_v40, %v316_v45  ;;  %v1413_v48 = vadd.f32 %v335_v40, %v322_v47  ;;  %v1416_v49 = vadd.f32 %v335_v40, %v320_v37  ;;  %v344_v51 = vadd.f32 %v335_v40, %v326_v50 }
 0x1ab   :  { %363 = vperm.xlu0 %1201, %v1401_v41   ;;  %357 = vperm.xlu1 %1200, %v1403_v42   ;;  %v449_v36 = vsub.s32 4, %v1381_v28  ;;  %v453_v45 = vsub.s32 5, %v1381_v28 }
 0x1af   :  { %372 = vperm.xlu0 %1201, %v1407_v43   ;;  %354 = vperm.xlu1 %1200, %v337_v44  }
 0x1b3   :  { %360 = vperm.xlu1 %1200, %v1410_v46  }
 0x1b7   :  { %369 = vperm.xlu1 %1200, %v1413_v48  }
 0x1bb   :  { %366 = vperm.xlu1 %1200, %v1416_v49  }
 0x1bf   :  { %375 = vperm.xlu1 %1200, %v344_v51  }
 0x226   :  { %v358_v52 = vpop.permute.xlu1 %357  ;;  %v364_v57 = vpop.permute.xlu0 %363 }
 0x227   :  { %v386_v60 = vrot.slane %v358_v52, %v1424_v55  ;;  %v394_v63 = vrot.slane %v364_v57, %v1424_v55  ;;  %v457_v52 = vsub.s32 6, %v1381_v28 }
 0x22a   :  { %v355_v54 = vpop.permute.xlu1 %354  ;;  %v373_v0 = vpop.permute.xlu0 %372 }
 0x22b   :  { %v382_v58 = vrot.slane %v355_v54, %v1424_v55  ;;  %v406_v6 = vrot.slane %v373_v0, %v1424_v55 }
 0x22d   :  { %v412_v62 = vsel %vm411_vm0, %v386_v60, %v382_v58 }
 0x22e   :  { %v361_v56 = vpop.permute.xlu1 %360 }
 0x22f   :  { %v390_v59 = vrot.slane %v361_v56, %v1424_v55 }
 0x231   :  { %v414_v26 = vsel %vm413_vm1, %v390_v59, %v412_v62 }
 0x232   :  { %v370_v61 = vpop.permute.xlu1 %369  ;;  %v416_v5 = vsel %vm415_vm2, %v394_v63, %v414_v26 }
 0x233   :  { %v402_v3 = vrot.slane %v370_v61, %v1424_v55 }
 0x236   :  { %v367_v1 = vpop.permute.xlu1 %366 }
 0x237   :  { %v398_v2 = vrot.slane %v367_v1, %v1424_v55 }
 0x239   :  { %v418_v7 = vsel %vm417_vm3, %v398_v2, %v416_v5 }
 0x23a   :  { %v376_v8 = vpop.permute.xlu1 %375  ;;  %v420_v9 = vsel %vm419_vm4, %v402_v3, %v418_v7 }
 0x23b   :  { %v410_v10 = vrot.slane %v376_v8, %v1424_v55  ;;  %v422_v11 = vsel %vm421_vm5, %v406_v6, %v420_v9 }
 0x23d   :  { %v424_v12 = vsel %vm423_vm6, %v410_v10, %v422_v11 }
 0x23e   :  { %v427_v13 = vsel %vm426_vm7, %v424_v12, -inf }
 0x23f   :  { %428 = vmax.xlane.f32.xlu0 %v427_v13 }
 0x2c8   :  { %v429_v24 = vpop.xlane.xlu0 %428 }
 0x2c9   :  { %v434_v25 = vrot.slane %v429_v24, %v1385_v35  ;;  %v438_v27 = vrot.slane %v429_v24, %v437_v14  ;;  %v462_v29 = vrot.slane %v429_v24, %v461_v15  ;;  %v442_v31 = vrot.slane %v429_v24, %v441_v16 }
 0x2ca   :  { %v446_v38 = vrot.slane %v429_v24, %v445_v30  ;;  %v450_v50 = vrot.slane %v429_v24, %v449_v36  ;;  %v458_v56 = vrot.slane %v429_v24, %v457_v52 }
 0x2cb   :  { %v471_v32 = vsub.f32 %v337_v44, %v434_v25  ;;  %v472_v33 = vsub.f32 %v1403_v42, %v438_v27  ;;  %v478_v37 = vsub.f32 %v344_v51, %v462_v29  ;;  %v473_v39 = vsub.f32 %v1410_v46, %v442_v31 }
 0x2cc   :  { %v474_v44 = vsub.f32 %v1401_v41, %v446_v38  ;;  %v454_v51 = vrot.slane %v429_v24, %v453_v45  ;;  %v475_v46 = vsub.f32 %v1416_v49, %v450_v50  ;;  %v477_v59 = vsub.f32 %v1407_v43, %v458_v56 }
 0x2cd   :  { %v479_v34 = vmul.f32 1.442695, %v471_v32  ;;  %v481_v40 = vmul.f32 1.442695, %v472_v33  ;;  %v493_v47 = vmul.f32 1.442695, %v478_v37 }
 0x2ce   :  { %v483_v42 = vmul.f32 1.442695, %v473_v39  ;;  %v485_v54 = vmul.f32 1.442695, %v474_v44  ;;  %v476_v57 = vsub.f32 %v1413_v48, %v454_v51  ;;  %v487_v58 = vmul.f32 1.442695, %v475_v46 }
 0x2cf   :  { %1203 = vpow2.f32 %v479_v34  ;;  %v491_v49 = vmul.f32 1.442695, %v477_v59 }
 0x2d0   :  { %1205 = vpow2.f32 %v481_v40  ;;  %v489_v60 = vmul.f32 1.442695, %v476_v57 }
 0x2d1   :  { %1207 = vpow2.f32 %v493_v47 }
 0x2d2   :  { %1209 = vpow2.f32 %v483_v42 }
 0x2d3   :  { %1211 = vpow2.f32 %v485_v54 }
 0x2d4   :  { %1213 = vpow2.f32 %v487_v58 }
 0x2d5   :  { %1215 = vpow2.f32 %v489_v60  ;;  %v1314_v60 = vmov 0.0  }
 0x2d6   :  { %1217 = vpow2.f32 %v491_v49  ;;  %1171 = vmatprep.subr.mxu1 %v1314_v60  ;;  %1187 = vmatprep.mubr.msk.f32.mxu1 %vm1315_vm8, %v1314_v60 }
 0x2d7   :  { %1172 = vmatpush3.msra.mxu1 %v1377_v23  ;;  %v815_v23 = vadd.s32 4294967264, %v1420_v53 }
 0x2d8   :  { %1173 = vmatprep.subr.mxu1 %v1314_v60 }
 0x2d9   :  { %1174 = vmatpush3.msra.mxu1 %v1373_v22  ;;  %v733_v22 = vadd.s32 4294967280, %v1420_v53 }
 0x2da   :  { %1175 = vmatprep.subr.mxu1 %v1314_v60 }
 0x2db   :  { %1176 = vmatpush3.msra.mxu1 %v1371_v21  ;;  %v692_v21 = vadd.s32 4294967288, %v1420_v53 }
 0x2dc   :  { %v1204_v41 = vpop.eup %1203  ;;  %1177 = vmatprep.subr.mxu1 %v1314_v60 }
 0x2dd   :  { %504 = vperm.xlu1 %1200, %v1204_v41   ;;  %v1206_v61 = vpop.eup %1205  ;;  %1178 = vmatpush3.msra.mxu1 %v1367_v20  ;;  %v774_v20 = vadd.s32 4294967272, %v1420_v53 }
 0x2de   :  { %v1470_v62 = vpop.eup %1207  ;;  %1179 = vmatprep.subr.mxu1 %v1314_v60 }
 0x2df   :  { %v1210_v26 = vpop.eup %1209  ;;  %525 = vperm.xlu0 %1201, %v1470_v62   ;;  %1180 = vmatpush3.msra.mxu1 %v1365_v19  ;;  %v897_v19 = vadd.s32 4294967248, %v1420_v53 }
 0x2e0   :  { %v1212_v48 = vpop.eup %1211  ;;  %1181 = vmatprep.subr.mxu1 %v1314_v60 }
 0x2e1   :  { %507 = vperm.xlu1 %1200, %v1206_v61   ;;  %v1214_v63 = vpop.eup %1213  ;;  %1182 = vmatpush3.msra.mxu1 %v1361_v18  ;;  %v938_v18 = vadd.s32 4294967240, %v1420_v53 }
 0x2e2   :  { %v1216_v0 = vpop.eup %1215  ;;  %1183 = vmatprep.subr.mxu1 %v1314_v60 }
 0x2e3   :  { %v1218_v43 = vpop.eup %1217  ;;  %1184 = vmatpush3.msra.mxu1 %v1359_v17  ;;  %v1522_v17 = vsub.s32 %v692_v21, %v1381_v28 }
 0x2e4   :  { %1185 = vmatprep.subr.mxu1 %v1314_v60 }
 0x2e5   :  { %510 = vperm.xlu1 %1200, %v1210_v26   ;;  %1186 = vmatpush3.msra.mxu1 %v1356_v4  ;;  %v1525_v4 = vsub.s32 %v733_v22, %v1381_v28 }
 0x2e9   :  { %513 = vperm.xlu1 %1200, %v1212_v48  }
 0x2ed   :  { %516 = vperm.xlu1 %1200, %v1214_v63  }
 0x2f1   :  { %519 = vperm.xlu1 %1200, %v1216_v0  }
 0x2f5   :  { %522 = vperm.xlu1 %1200, %v1218_v43  }
 0x358   :  { %v505_v1 = vpop.permute.xlu1 %504 }
 0x359   :  { %v530_v9 = vrot.slane %v505_v1, %v1424_v55 }
 0x35a   :  { %v526_v25 = vpop.permute.xlu0 %525 }
 0x35b   :  { %v558_v34 = vrot.slane %v526_v25, %v1424_v55 }
 0x35c   :  { %v508_v2 = vpop.permute.xlu1 %507 }
 0x35d   :  { %v534_v7 = vrot.slane %v508_v2, %v1424_v55 }
 0x35f   :  { %v559_v13 = vsel %vm411_vm0, %v534_v7, %v530_v9 }
 0x360   :  { %v511_v3 = vpop.permute.xlu1 %510 }
 0x361   :  { %v538_v8 = vrot.slane %v511_v3, %v1424_v55 }
 0x363   :  { %v560_v27 = vsel %vm413_vm1, %v538_v8, %v559_v13 }
 0x364   :  { %v514_v5 = vpop.permute.xlu1 %513 }
 0x365   :  { %v542_v10 = vrot.slane %v514_v5, %v1424_v55 }
 0x367   :  { %v561_v29 = vsel %vm415_vm2, %v542_v10, %v560_v27 }
 0x368   :  { %v517_v6 = vpop.permute.xlu1 %516 }
 0x369   :  { %v546_v12 = vrot.slane %v517_v6, %v1424_v55 }
 0x36b   :  { %v562_v32 = vsel %vm417_vm3, %v546_v12, %v561_v29 }
 0x36c   :  { %v520_v11 = vpop.permute.xlu1 %519 }
 0x36d   :  { %v550_v24 = vrot.slane %v520_v11, %v1424_v55 }
 0x36f   :  { %v563_v37 = vsel %vm419_vm4, %v550_v24, %v562_v32 }
 0x370   :  { %v523_v31 = vpop.permute.xlu1 %522 }
 0x371   :  { %v554_v33 = vrot.slane %v523_v31, %v1424_v55 }
 0x373   :  { %v564_v38 = vsel %vm421_vm5, %v554_v33, %v563_v37 }
 0x374   :  { %v565_v39 = vsel %vm423_vm6, %v558_v34, %v564_v38 }
 0x375   :  { %v567_v40 = vsel %vm426_vm7, %v565_v39, 0.0 }
 0x376   :  { %568 = vadd.xlane.f32.xlu1 %v567_v40 }
 0x3ff   :  { %v569_v47 = vpop.xlane.xlu1 %568 }
 0x400   :  { %1219 = vrcp.f32 %v569_v47 }
 0x40d   :  { %v1220_v50 = vpop.eup %1219 }
 0x40e   :  { %v591_v44 = vrot.slane %v1220_v50, %v449_v36  ;;  %v575_v42 = vrot.slane %v1220_v50, %v1385_v35  ;;  %v579_v54 = vrot.slane %v1220_v50, %v437_v14  ;;  %v583_v57 = vrot.slane %v1220_v50, %v441_v16 }
 0x40f   :  { %v587_v59 = vrot.slane %v1220_v50, %v445_v30  ;;  %v595_v35 = vrot.slane %v1220_v50, %v453_v45  ;;  %v599_v14 = vrot.slane %v1220_v50, %v457_v52  ;;  %v603_v30 = vrot.slane %v1220_v50, %v461_v15 }
 0x410   :  { %v616_v51 = vmul.f32 %v1214_v63, %v591_v44  ;;  %v612_v46 = vmul.f32 %v1204_v41, %v575_v42  ;;  %v613_v56 = vmul.f32 %v1206_v61, %v579_v54  ;;  %v614_v58 = vmul.f32 %v1210_v26, %v583_v57 }
 0x411   :  { %v615_v36 = vmul.f32 %v1212_v48, %v587_v59  ;;  %v617_v41 = vmul.f32 %v1216_v0, %v595_v35  ;;  %v618_v16 = vmul.f32 %v1218_v43, %v599_v14  ;;  %v619_v45 = vmul.f32 %v1470_v62, %v603_v30 }
 0x412   :  { %641 = vperm.xlu1 %1200, %v616_v51   ;;  %629 = vperm.xlu0 %1201, %v612_v46   ;;  %v856_v15 = vadd.s32 4294967256, %v1420_v53  ;;  %v994_v52 = vmul.u32 8, %v1381_v28  ;;  %v1528_v61 = vsub.s32 %v774_v20, %v1381_v28  ;;  %v1531_v62 = vsub.s32 %v815_v23, %v1381_v28 }
 0x413   :  { %v1539_v63 = vsub.s32 %v897_v19, %v1381_v28  ;;  %v1542_v0 = vsub.s32 %v938_v18, %v1381_v28 }
 0x414   :  { %v1536_v48 = vsub.s32 %v856_v15, %v1381_v28  ;;  %v1547_v1 = vsub.s32 %v1420_v53, %v994_v52 }
 0x416   :  { %632 = vperm.xlu0 %1201, %v613_v56   ;;  %vm996_vm13 = vcmp.ge.s32.totalorder %v1547_v1, 0  ;;  %vm997_vm14 = vcmp.lt.s32.totalorder %v1547_v1, 8 }
 0x41a   :  { %635 = vperm.xlu0 %1201, %v614_v58  }
 0x41e   :  { %638 = vperm.xlu0 %1201, %v615_v36  }
 0x422   :  { %644 = vperm.xlu0 %1201, %v617_v41  }
 0x426   :  { %647 = vperm.xlu0 %1201, %v618_v16  }
 0x42a   :  { %650 = vperm.xlu0 %1201, %v619_v45  }
 0x48d   :  { %v1533_v49 = vpop.permute.xlu1 %641  ;;  %v630_v26 = vpop.permute.xlu0 %629 }
 0x48e   :  { %v671_v43 = vrot.slane %v1533_v49, %v1424_v55  ;;  %v712_v2 = vrot.slane %v1533_v49, %v1522_v17  ;;  %v753_v3 = vrot.slane %v1533_v49, %v1525_v4  ;;  %v794_v5 = vrot.slane %v1533_v49, %v1528_v61 }
 0x48f   :  { %v835_v6 = vrot.slane %v1533_v49, %v1531_v62  ;;  %v876_v7 = vrot.slane %v1533_v49, %v1536_v48  ;;  %v917_v53 = vrot.slane %v1533_v49, %v1539_v63  ;;  %v958_v8 = vrot.slane %v1533_v49, %v1542_v0 }
 0x490   :  { %v655_v10 = vrot.slane %v630_v26, %v1424_v55  ;;  %v696_v24 = vrot.slane %v630_v26, %v1522_v17  ;;  %v737_v25 = vrot.slane %v630_v26, %v1525_v4  ;;  %v778_v27 = vrot.slane %v630_v26, %v1528_v61 }
 0x491   :  { %v633_v28 = vpop.permute.xlu0 %632  ;;  %v819_v29 = vrot.slane %v630_v26, %v1531_v62  ;;  %v860_v31 = vrot.slane %v630_v26, %v1536_v48  ;;  %v901_v38 = vrot.slane %v630_v26, %v1539_v63  ;;  %v942_v39 = vrot.slane %v630_v26, %v1542_v0 }
 0x492   :  { %v659_v9 = vrot.slane %v633_v28, %v1424_v55  ;;  %v700_v11 = vrot.slane %v633_v28, %v1522_v17  ;;  %v741_v12 = vrot.slane %v633_v28, %v1525_v4  ;;  %v782_v13 = vrot.slane %v633_v28, %v1528_v61 }
 0x493   :  { %v823_v32 = vrot.slane %v633_v28, %v1531_v62  ;;  %v864_v33 = vrot.slane %v633_v28, %v1536_v48  ;;  %v905_v34 = vrot.slane %v633_v28, %v1539_v63  ;;  %v946_v47 = vrot.slane %v633_v28, %v1542_v0 }
 0x494   :  { %v684_v40 = vsel %vm411_vm0, %v659_v9, %v655_v10  ;;  %v725_v50 = vsel %vm411_vm0, %v700_v11, %v696_v24  ;;  %v766_v44 = vsel %vm411_vm0, %v741_v12, %v737_v25  ;;  %v807_v42 = vsel %vm411_vm0, %v782_v13, %v778_v27 }
 0x495   :  { %v636_v37 = vpop.permute.xlu0 %635  ;;  %v848_v58 = vsel %vm411_vm0, %v823_v32, %v819_v29  ;;  %v889_v59 = vsel %vm411_vm0, %v864_v33, %v860_v31  ;;  %v930_v41 = vsel %vm411_vm0, %v905_v34, %v901_v38  ;;  %v971_v20 = vsel %vm411_vm0, %v946_v47, %v942_v39 }
 0x496   :  { %v663_v51 = vrot.slane %v636_v37, %v1424_v55  ;;  %v704_v46 = vrot.slane %v636_v37, %v1522_v17  ;;  %v745_v54 = vrot.slane %v636_v37, %v1525_v4  ;;  %v786_v56 = vrot.slane %v636_v37, %v1528_v61 }
 0x497   :  { %v827_v57 = vrot.slane %v636_v37, %v1531_v62  ;;  %v868_v36 = vrot.slane %v636_v37, %v1536_v48  ;;  %v909_v14 = vrot.slane %v636_v37, %v1539_v63  ;;  %v950_v21 = vrot.slane %v636_v37, %v1542_v0 }
 0x498   :  { %v685_v45 = vsel %vm413_vm1, %v663_v51, %v684_v40  ;;  %v726_v23 = vsel %vm413_vm1, %v704_v46, %v725_v50  ;;  %v767_v15 = vsel %vm413_vm1, %v745_v54, %v766_v44  ;;  %v808_v19 = vsel %vm413_vm1, %v786_v56, %v807_v42 }
 0x499   :  { %v1591_v35 = vpop.permute.xlu0 %638  ;;  %v849_v18 = vsel %vm413_vm1, %v827_v57, %v848_v58  ;;  %v890_v10 = vsel %vm413_vm1, %v868_v36, %v889_v59  ;;  %v931_v24 = vsel %vm413_vm1, %v909_v14, %v930_v41  ;;  %v972_v31 = vsel %vm413_vm1, %v950_v21, %v971_v20  ;;  %vm998_vm1 = vmand %vm996_vm13, %vm997_vm14 }
 0x49a   :  { %v667_v60 = vrot.slane %v1591_v35, %v1424_v55  ;;  %v708_v16 = vrot.slane %v1591_v35, %v1522_v17  ;;  %v749_v30 = vrot.slane %v1591_v35, %v1525_v4  ;;  %v790_v22 = vrot.slane %v1591_v35, %v1528_v61 }
 0x49b   :  { %v831_v26 = vrot.slane %v1591_v35, %v1531_v62  ;;  %v872_v28 = vrot.slane %v1591_v35, %v1536_v48  ;;  %v913_v32 = vrot.slane %v1591_v35, %v1539_v63  ;;  %v954_v33 = vrot.slane %v1591_v35, %v1542_v0 }
 0x49c   :  { %v686_v52 = vsel %vm415_vm2, %v667_v60, %v685_v45  ;;  %v727_v11 = vsel %vm415_vm2, %v708_v16, %v726_v23  ;;  %v768_v12 = vsel %vm415_vm2, %v749_v30, %v767_v15  ;;  %v809_v25 = vsel %vm415_vm2, %v790_v22, %v808_v19 }
 0x49d   :  { %v1615_v9 = vpop.permute.xlu0 %644  ;;  %v687_v34 = vsel %vm417_vm3, %v671_v43, %v686_v52  ;;  %v728_v38 = vsel %vm417_vm3, %v712_v2, %v727_v11  ;;  %v769_v40 = vsel %vm417_vm3, %v753_v3, %v768_v12  ;;  %v850_v47 = vsel %vm415_vm2, %v831_v26, %v849_v18 }
 0x49e   :  { %v675_v13 = vrot.slane %v1615_v9, %v1424_v55  ;;  %v716_v27 = vrot.slane %v1615_v9, %v1522_v17  ;;  %v757_v29 = vrot.slane %v1615_v9, %v1525_v4  ;;  %v798_v37 = vrot.slane %v1615_v9, %v1528_v61 }
 0x49f   :  { %v891_v50 = vsel %vm415_vm2, %v872_v28, %v890_v10  ;;  %v839_v44 = vrot.slane %v1615_v9, %v1531_v62  ;;  %v880_v2 = vrot.slane %v1615_v9, %v1536_v48  ;;  %v810_v42 = vsel %vm417_vm3, %v794_v5, %v809_v25 }
 0x4a0   :  { %v688_v43 = vsel %vm419_vm4, %v675_v13, %v687_v34  ;;  %v729_v3 = vsel %vm419_vm4, %v716_v27, %v728_v38  ;;  %v770_v54 = vsel %vm419_vm4, %v757_v29, %v769_v40  ;;  %v811_v57 = vsel %vm419_vm4, %v798_v37, %v810_v42 }
 0x4a1   :  { %v1643_v39 = vpop.permute.xlu0 %647  ;;  %v851_v5 = vsel %vm417_vm3, %v835_v6, %v850_v47  ;;  %v892_v58 = vsel %vm417_vm3, %v876_v7, %v891_v50  ;;  %v921_v6 = vrot.slane %v1615_v9, %v1539_v63  ;;  %v932_v41 = vsel %vm415_vm2, %v913_v32, %v931_v24 }
 0x4a2   :  { %v679_v51 = vrot.slane %v1643_v39, %v1424_v55  ;;  %v720_v46 = vrot.slane %v1643_v39, %v1522_v17  ;;  %v761_v56 = vrot.slane %v1643_v39, %v1525_v4  ;;  %v802_v59 = vrot.slane %v1643_v39, %v1528_v61 }
 0x4a3   :  { %v843_v36 = vrot.slane %v1643_v39, %v1531_v62  ;;  %v852_v16 = vsel %vm419_vm4, %v839_v44, %v851_v5  ;;  %vm990_vm0 = vcmask 457728   ;;  %v884_v21 = vrot.slane %v1643_v39, %v1536_v48 }
 0x4a4   :  { %v689_v30 = vsel %vm421_vm5, %v679_v51, %v688_v43  ;;  %v730_v45 = vsel %vm421_vm5, %v720_v46, %v729_v3  ;;  %v893_v22 = vsel %vm419_vm4, %v880_v2, %v892_v58  ;;  %v812_v19 = vsel %vm421_vm5, %v802_v59, %v811_v57 }
 0x4a5   :  { %v651_v35 = vpop.permute.xlu0 %650  ;;  %v853_v18 = vsel %vm421_vm5, %v843_v36, %v852_v16  ;;  %v925_v26 = vrot.slane %v1643_v39, %v1539_v63  ;;  %v962_v28 = vrot.slane %v1615_v9, %v1542_v0  ;;  %v894_v10 = vsel %vm421_vm5, %v884_v21, %v893_v22 }
 0x4a6   :  { %v683_v7 = vrot.slane %v651_v35, %v1424_v55  ;;  %v724_v14 = vrot.slane %v651_v35, %v1522_v17  ;;  %v765_v60 = vrot.slane %v651_v35, %v1525_v4  ;;  %v806_v17 = vrot.slane %v651_v35, %v1528_v61 }
 0x4a7   :  { %v771_v4 = vsel %vm421_vm5, %v761_v56, %v770_v54  ;;  %v847_v23 = vrot.slane %v651_v35, %v1531_v62  ;;  %v888_v52 = vrot.slane %v651_v35, %v1536_v48  ;;  %v973_v61 = vsel %vm415_vm2, %v954_v33, %v972_v31 }
 0x4a8   :  { %v690_v20 = vsel %vm423_vm6, %v683_v7, %v689_v30  ;;  %v731_v55 = vsel %vm423_vm6, %v724_v14, %v730_v45  ;;  %v772_v15 = vsel %vm423_vm6, %v765_v60, %v771_v4  ;;  %v929_v62 = vrot.slane %v651_v35, %v1539_v63 }
 0x4a9   :  { %v966_v11 = vrot.slane %v1643_v39, %v1542_v0  ;;  %v979_v12 = vsel %vm426_vm7, %v690_v20, %v731_v55  ;;  %v813_v13 = vsel %vm423_vm6, %v806_v17, %v812_v19  ;;  %v933_v48 = vsel %vm417_vm3, %v917_v53, %v932_v41 }
 0x4aa   :  { %v970_v9 = vrot.slane %v651_v35, %v1542_v0  ;;  %v981_v24 = vsel %vm980_vm9, %v979_v12, %v772_v15  ;;  %v854_v25 = vsel %vm423_vm6, %v847_v23, %v853_v18  ;;  %v934_v27 = vsel %vm419_vm4, %v921_v6, %v933_v48 }
 0x4ab   :  { %v974_v29 = vsel %vm417_vm3, %v958_v8, %v973_v61  ;;  %v983_v31 = vsel %vm982_vm10, %v981_v24, %v813_v13  ;;  %v895_v32 = vsel %vm423_vm6, %v888_v52, %v894_v10  ;;  %v935_v63 = vsel %vm421_vm5, %v925_v26, %v934_v27 }
 0x4ac   :  { %v975_v53 = vsel %vm419_vm4, %v962_v28, %v974_v29  ;;  %v985_v33 = vsel %vm984_vm11, %v983_v31, %v854_v25  ;;  %v936_v34 = vsel %vm423_vm6, %v929_v62, %v935_v63  ;;  %vm1000_vm2 = vcmask 523264  }
 0x4ad   :  { %v976_v37 = vsel %vm421_vm5, %v966_v11, %v975_v53  ;;  %v987_v38 = vsel %vm986_vm12, %v985_v33, %v895_v32 }
 0x4ae   :  { %v977_v49 = vsel %vm423_vm6, %v970_v9, %v976_v37  ;;  %v989_v0 = vsel %vm988_vm15, %v987_v38, %v936_v34 }
 0x4af   :  { %v991_v8 = vsel %vm990_vm0, %v989_v0, %v977_v49 }
 0x4b0   :  { %v999_v39 = vsel %vm998_vm1, %v991_v8, 0.0 }
 0x4b1   :  { %1188 = vmatmul.mubr.msk.f32.vlgmr.msra.gmra.mxu1 %vm1000_vm2, %v999_v39 }
 0x571   :  { %v1070_v40 = vpop.f32.mrf.mxu1 }
 0x572   :  { %1074 = vst [vmem:[#allocation8] sm:$0xff] %v1070_v40 }
 0x573   :  { %v1189_v47 = vpop.f32.mrf.mxu1 }
 0x574   :  { %1292 = shalt.err (!%p1289_p5)
}
 0x575   :  { %1084 = dma.vmem_to_hbm [thread:$0]  %s1082_s10, 128, %s1750_s5, [#allocation4]  }
 0x576   :  { %1305 = dma.done.wait [#allocation4], 128  }
 0x577   :  { %1306 = vsyncadd [#allocation4], 4294967168 }
 0x578   :  { %1088 = vsyncpa [#allocation3], 1 }
 0x579   :  { %1089 = vsyncpa [#allocation6], 1 }
 0x57a   :  { %1090 = vsyncpa [#allocation4], 1 }

</bundles_post_ra>
